<compile_context>
chip_gen: v7x
topology: tpu7x:2x2x1
jax: 0.10.0
libtpu: 0.0.40
codegen_flags: <defaults>
</compile_context>

<pallas_src>
import functools
import math

import jax
import jax.numpy as jnp
from jax import lax
from jax.experimental import pallas as pl
from jax.experimental.pallas import tpu as pltpu


# ---------------------------------------------------------------------------
# hardware / tiling helpers
# ---------------------------------------------------------------------------

def _round_up(x, m):
    return ((x + m - 1) // m) * m


@functools.lru_cache(maxsize=1)
def _vmem_limit_bytes():
    """Generation-aware VMEM budget (~75% of physical VMEM)."""
    cap = 64 * 1024 * 1024                      # conservative default (v7x per-TC)
    try:
        info = pltpu.get_tpu_info()
        cap = int(getattr(info, "vmem_capacity_bytes", cap))
    except Exception:
        pass
    return max(32 * 1024 * 1024, (cap * 3) // 4)


def _tile_budget():
    # leave headroom for compiler-internal scratch / semaphores
    return _vmem_limit_bytes() - (8 << 20)


def _pick_m_tile(M, preferred=256):
    """Row (sublane / MXU-row) tile.  Full M when small, else 8/128-aligned tile."""
    if M <= preferred:
        return M, M                              # block == full dim -> always legal
    return preferred, _round_up(M, preferred)


def _pick_head_group(num_heads, head_dim):
    """Smallest head group whose lane width is a multiple of 128 (else all heads)."""
    for hb in range(1, num_heads + 1):
        if num_heads % hb == 0 and (hb * head_dim) % 128 == 0:
            return hb
    return num_heads                             # full-H block (legal: equals array dim)


def _pad2d(x, rows, cols):
    r, c = x.shape
    if r == rows and c == cols:
        return x
    return jnp.pad(x, ((0, rows - r), (0, cols - c)))


_SINGLE_BUFFER_MIN_BYTES = 2 * 1024 * 1024


def _maybe_single_buffered(shape, index_map, nbytes):
    """Single-buffer big constant-index operands (saves VMEM, esp. on v7x)."""
    if nbytes > _SINGLE_BUFFER_MIN_BYTES:
        return pl.BlockSpec(shape, index_map, pipeline_mode=pl.Buffered(1))
    return pl.BlockSpec(shape, index_map)


# ---------------------------------------------------------------------------
# kernel 1: Y = X @ W + b  (optionally fused erf-GELU epilogue)
# ---------------------------------------------------------------------------

def _linear_kernel(x_ref, w_ref, b_ref, o_ref, *, act):
    y = jnp.dot(x_ref[...], w_ref[...], preferred_element_type=jnp.float32)
    y = y + b_ref[...].astype(jnp.float32)
    if act == "gelu":
        # BERT's original gelu: x * 0.5 * (1 + erf(x / sqrt(2))) -- f32 epilogue
        y = y * 0.5 * (1.0 + lax.erf(y * (1.0 / math.sqrt(2.0))))
    o_ref[...] = y.astype(o_ref.dtype)


def _linear(x2d, w, b, *, act=None, out_dtype, tm_pref=256):
    M, K = x2d.shape
    K2, N = w.shape
    assert K == K2

    tm, Mp = _pick_m_tile(M, tm_pref)
    x_item = x2d.dtype.itemsize
    w_item = w.dtype.itemsize
    o_item = jnp.dtype(out_dtype).itemsize
    budget = _tile_budget()

    def fits(tn):
        return 2 * (tm * K * x_item + K * tn * w_item + tn * 4 + tm * tn * o_item) <= budget

    # Prefer full-N resident weights (activations read once); else a 128-multiple
    # that divides N exactly (no per-call weight padding).
    if fits(N):
        tn, Np = N, N
    else:
        tn = None
        for t in (2048, 1536, 1024, 768, 512, 384, 256, 128):
            if t < N and N % t == 0 and fits(t):
                tn = t
                break
        if tn is None:
            tn = 512 if fits(512) else 128
        Np = _round_up(N, tn)

    xin = _pad2d(x2d, Mp, K)
    win = _pad2d(w, K, Np)
    bin_ = _pad2d(b.reshape(1, N), 1, Np)

    n_ntiles = Np // tn
    weight_spec = (_maybe_single_buffered((K, tn), lambda j, i: (0, j), K * tn * w_item)
                   if n_ntiles == 1 else pl.BlockSpec((K, tn), lambda j, i: (0, j)))

    out = pl.pallas_call(
        functools.partial(_linear_kernel, act=act),
        out_shape=jax.ShapeDtypeStruct((Mp, Np), out_dtype),
        grid_spec=pltpu.PrefetchScalarGridSpec(
            num_scalar_prefetch=0,
            # N-tile axis OUTER so the (K, tn) weight tile stays resident while
            # sweeping M tiles (inner axis).
            grid=(n_ntiles, Mp // tm),
            in_specs=[
                pl.BlockSpec((tm, K), lambda j, i: (i, 0)),   # activations
                weight_spec,                                  # weight (resident per j)
                pl.BlockSpec((1, tn), lambda j, i: (0, j)),   # bias row
            ],
            out_specs=pl.BlockSpec((tm, tn), lambda j, i: (i, j)),
        ),
        compiler_params=pltpu.CompilerParams(
            dimension_semantics=("parallel", "parallel"),
            vmem_limit_bytes=_vmem_limit_bytes(),
        ),
        cost_estimate=pl.CostEstimate(
            flops=int(2 * Mp * K * Np),
            transcendentals=int(Mp * Np) if act == "gelu" else 0,
            bytes_accessed=int(n_ntiles * Mp * K * x_item + K * Np * w_item
                               + Np * 4 + Mp * Np * o_item)),
    )(xin, win, bin_)

    if Mp != M or Np != N:
        out = out[:M, :N]
    return out


# ---------------------------------------------------------------------------
# kernel 1b: fused QKV projection written as a stacked (3, M, H) tensor
# ---------------------------------------------------------------------------

def _qkv_linear(x2d, w, b, *, hidden_size, out_dtype, tm_pref=256):
    """Returns QKV stacked as (3, M, H) so attention needs NO head transposes."""
    M, K = x2d.shape
    H = hidden_size
    N = 3 * H
    assert w.shape == (K, N)

    if H % 128 != 0:
        # Small-hidden fallback (lane-tiling of the (K, 3H) weight would be illegal).
        y = _linear(x2d, w, b, act=None, out_dtype=out_dtype, tm_pref=tm_pref)
        return jnp.transpose(y.reshape(M, 3, H), (1, 0, 2))

    tm, Mp = _pick_m_tile(M, tm_pref)
    x_item = x2d.dtype.itemsize
    w_item = w.dtype.itemsize
    o_item = jnp.dtype(out_dtype).itemsize
    budget = _tile_budget()

    def fits(tn):
        return 2 * (tm * K * x_item + K * tn * w_item + tn * 4 + tm * tn * o_item) <= budget

    cands = [t for t in (H, 1024, 768, 512, 384, 256, 128)
             if t <= H and H % t == 0 and t % 128 == 0]
    tn = next((t for t in cands if fits(t)), cands[-1])
    n_hb = H // tn                      # lane blocks per q/k/v plane

    xin = _pad2d(x2d, Mp, K)

    out = pl.pallas_call(
        functools.partial(_linear_kernel, act=None),
        out_shape=jax.ShapeDtypeStruct((3, Mp, H), out_dtype),
        grid_spec=pltpu.PrefetchScalarGridSpec(
            num_scalar_prefetch=0,
            grid=(3 * n_hb, Mp // tm),          # weight axis outer -> resident per j
            in_specs=[
                pl.BlockSpec((tm, K), lambda j, i: (i, 0)),
                pl.BlockSpec((K, tn), lambda j, i: (0, j)),
                pl.BlockSpec((1, tn), lambda j, i: (0, j)),
            ],
            out_specs=pl.BlockSpec((None, tm, tn),
                                   lambda j, i: (j // n_hb, i, j % n_hb)),
        ),
        compiler_params=pltpu.CompilerParams(
            dimension_semantics=("parallel", "parallel"),
            vmem_limit_bytes=_vmem_limit_bytes(),
        ),
        cost_estimate=pl.CostEstimate(
            flops=int(2 * Mp * K * N),
            transcendentals=0,
            bytes_accessed=int((3 * n_hb) * Mp * K * x_item + K * N * w_item
                               + N * 4 + Mp * N * o_item)),
    )(xin, w, b.reshape(1, N))

    if Mp != M:
        out = out[:, :M, :]
    return out                                   # (3, M, H)


# ---------------------------------------------------------------------------
# kernel 2: Y = LayerNorm(X @ W + b + residual)   (BertSelfOutput / BertOutput)
# ---------------------------------------------------------------------------

def _linear_residual_layernorm_kernel(x_ref, w_ref, b_ref, res_ref,
                                      g_ref, beta_ref, o_ref, *, eps):
    y = jnp.dot(x_ref[...], w_ref[...], preferred_element_type=jnp.float32)
    y = y + b_ref[...].astype(jnp.float32) + res_ref[...].astype(jnp.float32)
    mu = jnp.mean(y, axis=-1, keepdims=True)
    var = jnp.mean(jnp.square(y - mu), axis=-1, keepdims=True)
    yhat = (y - mu) * lax.rsqrt(var + eps)
    o_ref[...] = (yhat * g_ref[...].astype(jnp.float32)
                  + beta_ref[...].astype(jnp.float32)).astype(o_ref.dtype)


def _linear_residual_layernorm(x2d, w, b, res2d, gamma, beta, *, eps,
                               out_dtype, tm_pref=256):
    M, K = x2d.shape
    K2, N = w.shape
    assert K == K2 and res2d.shape == (M, N)

    # LayerNorm reduces over the full feature dim -> keep N untiled (N == hidden_size).
    tm, Mp = _pick_m_tile(M, tm_pref)
    xin = _pad2d(x2d, Mp, K)
    rin = _pad2d(res2d, Mp, N)
    x_item = xin.dtype.itemsize
    w_item = w.dtype.itemsize
    o_item = jnp.dtype(out_dtype).itemsize

    # Constant-index resident weight -> single-buffer when large (VMEM saving on v7x).
    weight_spec = _maybe_single_buffered((K, N), lambda i: (0, 0), K * N * w_item)

    out = pl.pallas_call(
        functools.partial(_linear_residual_layernorm_kernel, eps=eps),
        out_shape=jax.ShapeDtypeStruct((Mp, N), out_dtype),
        grid_spec=pltpu.PrefetchScalarGridSpec(
            num_scalar_prefetch=0,
            grid=(Mp // tm,),
            in_specs=[
                pl.BlockSpec((tm, K), lambda i: (i, 0)),
                weight_spec,                               # resident weight
                pl.BlockSpec((1, N), lambda i: (0, 0)),    # bias
                pl.BlockSpec((tm, N), lambda i: (i, 0)),   # residual
                pl.BlockSpec((1, N), lambda i: (0, 0)),    # gamma
                pl.BlockSpec((1, N), lambda i: (0, 0)),    # beta
            ],
            out_specs=pl.BlockSpec((tm, N), lambda i: (i, 0)),
        ),
        compiler_params=pltpu.CompilerParams(
            dimension_semantics=("parallel",),
            vmem_limit_bytes=_vmem_limit_bytes(),
        ),
        cost_estimate=pl.CostEstimate(
            flops=int(2 * Mp * K * N + 10 * Mp * N),
            transcendentals=int(Mp),
            bytes_accessed=int(Mp * K * x_item + K * N * w_item + 3 * N * 4
                               + Mp * N * (rin.dtype.itemsize + o_item))),
    )(xin, w, b.reshape(1, N), rin, gamma.reshape(1, N), beta.reshape(1, N))

    if Mp != M:
        out = out[:M]
    return out


# ---------------------------------------------------------------------------
# kernel 3: per-(batch, head-group) self-attention, heads sliced via BlockSpec
# ---------------------------------------------------------------------------

def _attention_kernel(q_ref, k_ref, v_ref, m_ref, o_ref, *, sm_scale, heads, head_dim):
    mask = m_ref[...].astype(jnp.float32)          # (1, S) additive mask
    outs = []
    for h in range(heads):                         # static unroll over heads in block
        lo = h * head_dim
        q = q_ref[:, lo:lo + head_dim]             # (S, hd), kept in matmul dtype (bf16)
        k = k_ref[:, lo:lo + head_dim]
        v = v_ref[:, lo:lo + head_dim]
        s = lax.dot_general(q, k, (((1,), (1,)), ((), ())),
                            preferred_element_type=jnp.float32)
        s = s * sm_scale + mask
        s = s - jnp.max(s, axis=-1, keepdims=True)
        p = jnp.exp(s)
        p = p * pl.reciprocal(jnp.sum(p, axis=-1, keepdims=True), approx=True)
        outs.append(jnp.dot(p.astype(q.dtype), v, preferred_element_type=jnp.float32))
    ctx = outs[0] if heads == 1 else jnp.concatenate(outs, axis=-1)
    o_ref[...] = ctx.astype(o_ref.dtype)


def _attention(qkv, ext_mask, *, num_heads, out_dtype):
    # qkv: (3, B, S, H) stacked;  ext_mask: (B, 1, S) additive (-10000 on masked)
    _, B, S, H = qkv.shape
    hd = H // num_heads
    hb = _pick_head_group(num_heads, hd)           # heads per block (128-lane dense)
    gw = hb * hd
    ng = num_heads // hb
    sm_scale = 1.0 / math.sqrt(hd)
    # TODO(synk): switch to a flash-style KV-tiled online-softmax kernel for S >= ~1024.

    return pl.pallas_call(
        functools.partial(_attention_kernel, sm_scale=sm_scale, heads=hb, head_dim=hd),
        out_shape=jax.ShapeDtypeStruct((B, S, H), out_dtype),
        grid_spec=pltpu.PrefetchScalarGridSpec(
            num_scalar_prefetch=0,
            grid=(B, ng),
            in_specs=[
                pl.BlockSpec((None, None, S, gw), lambda b, g: (0, b, 0, g)),  # Q heads
                pl.BlockSpec((None, None, S, gw), lambda b, g: (1, b, 0, g)),  # K heads
                pl.BlockSpec((None, None, S, gw), lambda b, g: (2, b, 0, g)),  # V heads
                pl.BlockSpec((None, 1, S), lambda b, g: (b, 0, 0)),            # mask
            ],
            out_specs=pl.BlockSpec((None, S, gw), lambda b, g: (b, 0, g)),
        ),
        compiler_params=pltpu.CompilerParams(
            dimension_semantics=("parallel", "parallel"),
            vmem_limit_bytes=_vmem_limit_bytes(),
        ),
        cost_estimate=pl.CostEstimate(
            flops=int(4 * B * S * S * H),
            transcendentals=int(B * num_heads * S * S),
            bytes_accessed=int(3 * B * S * H * qkv.dtype.itemsize
                               + B * S * H * jnp.dtype(out_dtype).itemsize
                               + B * ng * S * 4)),
    )(qkv, qkv, qkv, ext_mask)


# ---------------------------------------------------------------------------
# BertLayer / BertEncoder wrappers
# ---------------------------------------------------------------------------

def bert_layer(hidden, ext_mask, p, *, num_heads, eps, compute_dtype):
    B, S, H = hidden.shape
    M = B * S
    x2d = hidden.reshape(M, H)                                 # f32 residual
    cd = compute_dtype
    mm_dtype = cd if cd is not None else x2d.dtype
    x_mm = x2d if x2d.dtype == mm_dtype else x2d.astype(mm_dtype)

    # 1) fused QKV projection -> stacked (3, M, H), no head-split transposes
    qkv = _qkv_linear(x_mm, p["w_qkv"], p["b_qkv"], hidden_size=H, out_dtype=mm_dtype)
    qkv = qkv.reshape(3, B, S, H)

    # 2) attention (head slicing / merging done by the kernel's BlockSpecs)
    ctx = _attention(qkv, ext_mask, num_heads=num_heads, out_dtype=mm_dtype)
    ctx2d = ctx.reshape(M, H)

    # 3) BertSelfOutput: dense + residual + LayerNorm (f32 epilogue / output)
    attn_out = _linear_residual_layernorm(
        ctx2d, p["wo"], p["bo"], x2d, p["ln1_g"], p["ln1_b"], eps=eps,
        out_dtype=hidden.dtype)

    # 4) BertIntermediate: dense + erf-GELU (output kept in matmul dtype)
    attn_mm = attn_out if attn_out.dtype == mm_dtype else attn_out.astype(mm_dtype)
    inter = _linear(attn_mm, p["wi"], p["bi"], act="gelu", out_dtype=mm_dtype)

    # 5) BertOutput: dense + residual + LayerNorm
    out = _linear_residual_layernorm(
        inter, p["wout"], p["bout"], attn_out, p["ln2_g"], p["ln2_b"], eps=eps,
        out_dtype=hidden.dtype)

    return out.reshape(B, S, H)


def bert_encoder(hidden_states, attention_mask, layer_params, *, num_heads,
                 eps=1e-12, compute_dtype=jnp.bfloat16, output_hidden_states=False):
    """hidden_states: [B,S,H]; attention_mask: [B,S] (1 = keep, 0 = pad)."""
    B, S, _ = hidden_states.shape
    # extended_attention_mask = (1 - mask) * -10000, broadcast over heads & query pos
    ext = ((1.0 - attention_mask.astype(jnp.float32)) * -10000.0).reshape(B, 1, S)

    # Prepare parameters once per forward: cast matmul weights to the compute dtype
    # (biases / LN params stay f32 for the f32 epilogues).
    prepped = []
    for p in layer_params:
        q = dict(p)
        if compute_dtype is not None:
            for name in ("w_qkv", "wo", "wi", "wout"):
                q[name] = q[name].astype(compute_dtype)
        prepped.append(q)

    h = hidden_states
    all_hidden = ()
    for p in prepped:
        if output_hidden_states:
            all_hidden = all_hidden + (h,)
        h = bert_layer(h, ext, p, num_heads=num_heads, eps=eps,
                       compute_dtype=compute_dtype)
    if output_hidden_states:
        all_hidden = all_hidden + (h,)
        return h, all_hidden
    return h


# ---------------------------------------------------------------------------
# pure-JAX reference (same math & matmul dtype, no Pallas)
# ---------------------------------------------------------------------------

def _ref_encoder(hidden_states, attention_mask, layer_params, *, num_heads,
                 eps=1e-12, matmul_dtype=None):
    B, S, H = hidden_states.shape
    hd = H // num_heads
    ext = ((1.0 - attention_mask.astype(jnp.float32)) * -10000.0)[:, None, None, :]

    def cast(t):
        return t.astype(matmul_dtype) if matmul_dtype is not None else t

    def mm(a, b):
        return jnp.dot(cast(a), cast(b), preferred_element_type=jnp.float32)

    def ln(x, g, b):
        mu = jnp.mean(x, axis=-1, keepdims=True)
        var = jnp.mean((x - mu) ** 2, axis=-1, keepdims=True)
        return (x - mu) / jnp.sqrt(var + eps) * g + b

    h = hidden_states
    for p in layer_params:
        x = h.reshape(B * S, H)
        qkv = mm(x, p["w_qkv"]) + p["b_qkv"]
        q, k, v = jnp.split(qkv, 3, axis=1)

        def heads(t):
            return t.reshape(B, S, num_heads, hd).transpose(0, 2, 1, 3)

        qh, kh, vh = heads(q), heads(k), heads(v)
        s = jnp.einsum("bhqd,bhkd->bhqk", cast(qh), cast(kh),
                       preferred_element_type=jnp.float32) / math.sqrt(hd) + ext
        probs = jax.nn.softmax(s, axis=-1)
        ctx = jnp.einsum("bhqk,bhkd->bhqd", cast(probs), cast(vh),
                         preferred_element_type=jnp.float32)
        ctx = ctx.transpose(0, 2, 1, 3).reshape(B * S, H)

        attn_out = ln(mm(ctx, p["wo"]) + p["bo"] + x, p["ln1_g"], p["ln1_b"])
        inter = mm(attn_out, p["wi"]) + p["bi"]
        inter = inter * 0.5 * (1.0 + lax.erf(inter / math.sqrt(2.0)))
        out = ln(mm(inter, p["wout"]) + p["bout"] + attn_out, p["ln2_g"], p["ln2_b"])
        h = out.reshape(B, S, H)
    return h


# ---------------------------------------------------------------------------
# deterministic synthetic parameters
# ---------------------------------------------------------------------------

def init_layer_params(key, H, I, dtype=jnp.float32):
    ks = jax.random.split(key, 12)

    def lin(kw, kb, fi, fo):
        w = jax.random.normal(kw, (fi, fo), dtype) * (1.0 / math.sqrt(fi))
        b = jax.random.normal(kb, (fo,), dtype) * 0.02
        return w, b

    w_qkv, b_qkv = lin(ks[0], ks[1], H, 3 * H)
    wo, bo = lin(ks[2], ks[3], H, H)
    wi, bi = lin(ks[4], ks[5], H, I)
    wout, bout = lin(ks[6], ks[7], I, H)
    ln1_g = 1.0 + 0.1 * jax.random.normal(ks[8], (H,), dtype)
    ln1_b = 0.02 * jax.random.normal(ks[9], (H,), dtype)
    ln2_g = 1.0 + 0.1 * jax.random.normal(ks[10], (H,), dtype)
    ln2_b = 0.02 * jax.random.normal(ks[11], (H,), dtype)
    return dict(w_qkv=w_qkv, b_qkv=b_qkv, wo=wo, bo=bo, wi=wi, bi=bi,
                wout=wout, bout=bout, ln1_g=ln1_g, ln1_b=ln1_b,
                ln2_g=ln2_g, ln2_b=ln2_b)


if __name__ == "__main__":
    # Small config consistent with the module:
    # batch=2, seq=8, hidden=32, heads=4, intermediate=128, layers=2
    B, S, H, I, NH, L = 2, 8, 32, 128, 4, 2
    EPS = 1e-12

    key = jax.random.PRNGKey(0)
    kx, kp = jax.random.split(key)

    hidden_states = jax.random.normal(kx, (B, S, H), dtype=jnp.float32)
    attention_mask = jnp.ones((B, S), dtype=jnp.float32)
    attention_mask = attention_mask.at[1, S - 2:].set(0.0)   # pad tail of 2nd sequence

    params = [init_layer_params(k, H, I) for k in jax.random.split(kp, L)]

    # bf16 matmul inputs by default (f32 accumulation + f32 epilogues).
    out = bert_encoder(hidden_states, attention_mask, params, num_heads=NH, eps=EPS,
                       compute_dtype=jnp.bfloat16)
    jax.block_until_ready(out)

    # Reference mirrors the bf16 matmul-input rounding so the comparison is tight.
    ref = _ref_encoder(hidden_states, attention_mask, params, num_heads=NH, eps=EPS,
                       matmul_dtype=jnp.bfloat16)
    assert out.shape == (B, S, H)
    err = float(jnp.max(jnp.abs(out - ref)))
    assert jnp.allclose(out, ref, atol=2e-2, rtol=2e-2), f"mismatch vs reference: {err}"

    print("KERNEL_OK")
</pallas_src>

<mosaic_0001>
module attributes {stable_mosaic.version = 11 : i64} {
  func.func @_linear_kernel(%arg0: i32, %arg1: i32, %arg2: memref<16x32xbf16, #tpu.memory_space<vmem>>, %arg3: memref<32x96xbf16, #tpu.memory_space<vmem>>, %arg4: memref<1x96xf32, #tpu.memory_space<vmem>>, %arg5: memref<16x96xbf16, #tpu.memory_space<vmem>>) attributes {dimension_semantics = [#tpu.dimension_semantics<parallel>, #tpu.dimension_semantics<parallel>], iteration_bounds = array<i64: 1, 1>, scalar_prefetch = 0 : i64, scratch_operands = 0 : i64, tpu.core_type = #tpu.core_type<tc>, window_params = [{transform_indices = @transform_0, window_bounds = array<i64: 16, 32>}, {transform_indices = @transform_1, window_bounds = array<i64: 32, 96>}, {transform_indices = @transform_2, window_bounds = array<i64: 1, 96>}, {transform_indices = @transform_3, window_bounds = array<i64: 16, 96>}]} {
    %c0 = arith.constant 0 : index
    %c0_0 = arith.constant 0 : index
    %0 = vector.load %arg2[%c0, %c0_0] : memref<16x32xbf16, #tpu.memory_space<vmem>>, vector<16x32xbf16>
    %c0_1 = arith.constant 0 : index
    %c0_2 = arith.constant 0 : index
    %1 = vector.load %arg3[%c0_1, %c0_2] : memref<32x96xbf16, #tpu.memory_space<vmem>>, vector<32x96xbf16>
    %cst = arith.constant dense<0.000000e+00> : vector<16x96xf32>
    %2 = tpu.matmul %0, %1, %cst {dimension_numbers = #tpu.dot_dimension_numbers<[1], [0], [0], [1], [0, 0, 1, 1], [], []>} : vector<16x32xbf16>, vector<32x96xbf16>, vector<16x96xf32> -> vector<16x96xf32>
    %c0_3 = arith.constant 0 : index
    %c0_4 = arith.constant 0 : index
    %3 = vector.load %arg4[%c0_3, %c0_4] : memref<1x96xf32, #tpu.memory_space<vmem>>, vector<1x96xf32>
    %4 = vector.broadcast %3 : vector<1x96xf32> to vector<16x96xf32>
    %5 = arith.addf %2, %4 : vector<16x96xf32>
    %6 = arith.truncf %5 : vector<16x96xf32> to vector<16x96xbf16>
    %c0_5 = arith.constant 0 : index
    %c0_6 = arith.constant 0 : index
    %7 = vector.load %arg5[%c0_5, %c0_6] : memref<16x96xbf16, #tpu.memory_space<vmem>>, vector<16x96xbf16>
    tpu.vector_store %arg5[%c0_5, %c0_6], %6 {strides = array<i32>} : memref<16x96xbf16, #tpu.memory_space<vmem>>, vector<16x96xbf16>,
    return
  }
  func.func @transform_0(%arg0: i32, %arg1: i32) -> (i32, i32) {
    %c0_i32 = arith.constant 0 : i32
    %c0_i32_0 = arith.constant 0 : i32
    return %arg1, %c0_i32 : i32, i32
  }
  func.func @transform_1(%arg0: i32, %arg1: i32) -> (i32, i32) {
    %c0_i32 = arith.constant 0 : i32
    %c0_i32_0 = arith.constant 0 : i32
    return %c0_i32, %arg0 : i32, i32
  }
  func.func @transform_2(%arg0: i32, %arg1: i32) -> (i32, i32) {
    %c0_i32 = arith.constant 0 : i32
    %c0_i32_0 = arith.constant 0 : i32
    return %c0_i32, %arg0 : i32, i32
  }
  func.func @transform_3(%arg0: i32, %arg1: i32) -> (i32, i32) {
    %c0_i32 = arith.constant 0 : i32
    return %arg1, %arg0 : i32, i32
  }
}

</mosaic_0001>

<bundles_post_ra>
// kernel: tpu_custom_call.1
= control target key start
LH: loop header
LB: loop body
LE: loop exit
PB: predicated region body
PF: predicated region fallthrough
CT: control target
= control target key end

     0   :  { %8 = vsyncpa [#allocation3], 0  ;;  %s325_s0 = inlined_call_operand.hbm [shape: bf16[16,32], index: 0, kind: input, shape index: {}]   ;;  %s326_s1 = inlined_call_operand.hbm [shape: bf16[32,96], index: 1, kind: input, shape index: {}]   ;;  %s327_s2 = inlined_call_operand.vmem [shape: f32[1,96], index: 2, kind: input, shape index: {}]   ;;  %s328_s3 = inlined_call_operand.hbm [shape: bf16[16,96], index: 3, kind: output, shape index: {}]  }
   0x1   :  { %9 = vsyncpa [#allocation6], 0 }
   0x2   :  { %10 = vsyncpa [#allocation4], 0  ;;  %s250_s12 = smov [#allocation2]   ;;  %s178_s16 = scalar_lea.hbm %s325_s0, 128 }
   0x3   :  { %s16_s13 = sshll.u32 %s250_s12, 4  ;;  %p179_p0 = scmp.ne.s32.totalorder %s325_s0, %s178_s16  ;;  %s17_s13 = int_to_ptr.vmem [resolvable:$true] %s16_s13 }
   0x4   :  { %p182_p1 = scmp.lt.u32.totalorder %s178_s16, %s325_s0 }
   0x6   :  { %p184_p2 = pnand %p182_p1, %p179_p0 }
   0x8   :  { %187 = shalt.err (!%p184_p2)
}
   0x9   :  { %s188_s21 = scalar_lea.vmem %s17_s13, 128  ;;  %p193_p4 = scmp.lt.s32.totalorder %s17_s13, %s17_s13 }
   0xa   :  { %p189_p3 = scmp.ne.s32.totalorder %s17_s13, %s188_s21  ;;  %p194_p5 = scmp.lt.s32.totalorder %s188_s21, %s188_s21 }
   0xc   :  { %p195_p6 = por %p194_p5, %p193_p4 }
   0xe   :  { %p196_p7 = pnand %p195_p6, %p189_p3 }
  0x10   :  { %199 = shalt.err (!%p196_p7)
}
  0x11   :  { %s251_s22 = smov 64   ;;  %s252_s23 = smov 4  }
  0x12   :  { %22 = dma.hbm_to_vmem [thread:$0]  %s325_s0, 128, %s17_s13, [#allocation3], %s251_s22, %s251_s22, %s252_s23  }
  0x13   :  { %s253_s26 = smov [#allocation5]   ;;  %s200_s30 = scalar_lea.hbm %s326_s1, 256 }
  0x14   :  { %s28_s27 = sshll.u32 %s253_s26, 4  ;;  %p201_p8 = scmp.ne.s32.totalorder %s326_s1, %s200_s30  ;;  %s29_s27 = int_to_ptr.vmem [resolvable:$true] %s28_s27 }
  0x15   :  { %p204_p9 = scmp.lt.u32.totalorder %s200_s30, %s326_s1 }
  0x17   :  { %p206_p10 = pnand %p204_p9, %p201_p8 }
  0x19   :  { %209 = shalt.err (!%p206_p10)
}
  0x1a   :  { %s210_s8 = scalar_lea.vmem %s29_s27, 256  ;;  %p215_p12 = scmp.lt.s32.totalorder %s29_s27, %s29_s27 }
  0x1b   :  { %p211_p11 = scmp.ne.s32.totalorder %s29_s27, %s210_s8  ;;  %p216_p13 = scmp.lt.s32.totalorder %s210_s8, %s210_s8 }
  0x1d   :  { %p217_p0 = por %p216_p13, %p215_p12 }
  0x1f   :  { %p218_p1 = pnand %p217_p0, %p211_p11 }
  0x21   :  { %221 = shalt.err (!%p218_p1)
}
  0x22   :  { %34 = dma.hbm_to_vmem [thread:$0]  %s326_s1, 256, %s29_s27, [#allocation6], %s251_s22, %s251_s22, %s252_s23  }
  0x23   :  { %244 = dma.done.wait [#allocation3], 128  }
  0x24   :  { %245 = vsyncadd [#allocation3], 4294967168 }
  0x25   :  { %246 = dma.done.wait [#allocation6], 256  }
  0x26   :  { %247 = vsyncadd [#allocation6], 4294967040  ;;  %v254_v0 = vmov 0.0   ;;  %vm255_vm0 = vmmov 0   ;;  %v175_v1 = vld [vmem:[#allocation5] sm:$0xff]   ;;  %v176_v2 = vld [vmem:[#allocation5 + $0x8] sm:$0xff]  }
  0x27   :  { %160 = vmatprep.subr.bf16.mxu0 %v254_v0  ;;  %164 = vmatprep.mubr.msk.bf16.mxu0 %vm255_vm0, %v254_v0  ;;  %v177_v3 = vld [vmem:[#allocation2] sm:$0xff]   ;;  %vm74_vm1 = vcmask 261120   ;;  %vm127_vm2 = vcmask 781312   ;;  %s256_s1 = smov [#allocation7]  }
  0x28   :  { %161 = vmatpush3.bf16.msra.mxu0 %v175_v1  ;;  %v148_v4 = vld [vmem:[%s327_s2] ss:$0 sm:$0xff]  ;;  %s135_s12 = sshll.u32 %s256_s1, 4  ;;  %s136_s12 = int_to_ptr.vmem [resolvable:$true] %s135_s12 }
  0x29   :  { %162 = vmatprep.subr.bf16.mxu0 %v254_v0  ;;  %s222_s13 = scalar_lea.vmem %s136_s12, 128  ;;  %p227_p3 = scmp.lt.s32.totalorder %s136_s12, %s136_s12 }
  0x2a   :  { %p223_p2 = scmp.ne.s32.totalorder %s136_s12, %s222_s13  ;;  %p228_p4 = scmp.lt.s32.totalorder %s222_s13, %s222_s13 }
  0x2c   :  { %163 = vmatpush3.bf16.msra.mxu0 %v176_v2  ;;  %p229_p5 = por %p228_p4, %p227_p3 }
  0x2e   :  { %p230_p6 = pnand %p229_p5, %p223_p2 }
  0x2f   :  { %165 = vmatmul.mubr.msk.bf16.vlgmr.msra.gmra.mrb[0].mxu0 %vm74_vm1, %v177_v3 }
 0x102   :  { %v112_v5 = vpop.f32.mrb[0].mxu0 }
 0x103   :  { %v113_v6 = vadd.f32 %v148_v4, %v112_v5  ;;  %v166_v7 = vpop.f32.mrb[1].mxu0 }
 0x104   :  { %v115_v8 = vpop.f32.mrb[2].mxu0 }
 0x105   :  { %v155_v9 = vpack.c.bf16 %v113_v6, %v113_v6  ;;  %v116_v10 = vadd.f32 %v148_v4, %v115_v8  ;;  %v167_v11 = vpop.f32.mrb[3].mxu0 }
 0x107   :  { %v156_v12 = vpack.c.bf16 %v116_v10, %v116_v10  ;;  %128 = vst.msk [vmem:[#allocation7] sm:$0xf] %vm127_vm2, %v155_v9 }
 0x109   :  { %129 = vst.msk [vmem:[#allocation7 + $0x4] sm:$0xf] %vm127_vm2, %v156_v12 }
 0x10a   :  { %233 = shalt.err (!%p230_p6)
}
 0x10b   :  { %s234_s15 = scalar_lea.hbm %s328_s3, 128 }
 0x10c   :  { %p235_p7 = scmp.ne.s32.totalorder %s328_s3, %s234_s15  ;;  %p238_p8 = scmp.lt.u32.totalorder %s234_s15, %s328_s3 }
 0x10e   :  { %p240_p9 = pnand %p238_p8, %p235_p7 }
 0x110   :  { %243 = shalt.err (!%p240_p9)
}
 0x111   :  { %141 = dma.vmem_to_hbm [thread:$0]  %s136_s12, 128, %s328_s3, [#allocation4], %s251_s22, %s251_s22, %s252_s23  }
 0x112   :  { %248 = dma.done.wait [#allocation4], 128  }
 0x113   :  { %249 = vsyncadd [#allocation4], 4294967168 }
 0x114   :  { %145 = vsyncpa [#allocation3], 1 }
 0x115   :  { %146 = vsyncpa [#allocation6], 1 }
 0x116   :  { %147 = vsyncpa [#allocation4], 1 }

</bundles_post_ra>
